<compile_context>
chip_gen: v7x
topology: tpu7x:2x2x1
jax: 0.10.0
libtpu: 0.0.40
codegen_flags: <defaults>
</compile_context>

<pallas_src>
import jax
import jax.numpy as jnp
from jax.experimental import pallas as pl
from jax.experimental.pallas import tpu as pltpu


def _round_up(a: int, m: int) -> int:
    return ((a + m - 1) // m) * m


def _make_kernel(M: int, F: int, g: int):
    """Kernel over node-group-folded blocks.

    x_ref: (tr, g*M*F) VMEM   w_ref: (1, F) VMEM   b_ref: (1,) SMEM
    o_ref: (tr, g*F)   VMEM
    Row r of the block holds g consecutive nodes; node j's metapath m features
    live in lanes [(j*M + m)*F : (j*M + m + 1)*F].
    """

    def kernel(x_ref, w_ref, b_ref, o_ref):
        x = x_ref[...]            # (tr, g*M*F) f32
        w = w_ref[...]            # (1, F) f32
        b = b_ref[0]              # scalar f32 (SMEM)
        for j in range(g):        # node within folded group (static unroll)
            acc = None
            for m in range(M):    # metapath (static unroll, M is small)
                s = (j * M + m) * F
                xm = x[:, s:s + F]                                   # (tr, F)
                att = jnp.sum(xm * w, axis=-1, keepdims=True) + b    # (tr, 1)
                term = att * xm                                      # (tr, F)
                acc = term if acc is None else acc + term
            o_ref[:, j * F:(j + 1) * F] = acc.astype(o_ref.dtype)

    return kernel


def attention_layer(x, w, b, *, block_nodes=None, x_block_bytes=4 << 20):
    """x: (N, M, F); w: (1, F) or (F,); b: (1,)/(1,1)/scalar  ->  (N, F) f32."""
    N, M, F = x.shape
    x_flat = jnp.asarray(x, jnp.float32).reshape(N, M * F)
    w = jnp.asarray(w, jnp.float32).reshape(1, F)
    b = jnp.asarray(b, jnp.float32).reshape(1)

    # Fold g consecutive nodes into one row so both the x block (g*M*F lanes)
    # and the out block (g*F lanes) are lane-dense multiples of 128 when F < 128.
    g = (128 // F) if (F < 128 and 128 % F == 0) else 1
    align = 8 * g                      # node-tile alignment (sublanes x fold)

    if block_nodes is None:
        tn = max(align, (x_block_bytes // (M * F * 4)) // align * align)
        # Keep >= 2 grid steps when N allows it (v7x: two TensorCores share the
        # "parallel" grid axis).
        tn = min(tn, _round_up(max(1, (N + 1) // 2), align))
    else:
        tn = _round_up(block_nodes, align)

    n_pad = _round_up(N, tn)
    if n_pad != N:
        x_flat = jnp.concatenate(
            [x_flat, jnp.zeros((n_pad - N, M * F), jnp.float32)], axis=0)

    rows = n_pad // g                  # node groups
    tr = tn // g                       # node groups per block (multiple of 8)
    x_fold = x_flat.reshape(rows, g * M * F)
    grid = (rows // tr,)

    cost = pl.CostEstimate(
        flops=4 * N * M * F,
        transcendentals=0,
        bytes_accessed=4 * (N * M * F + N * F + F + 1),
    )

    out = pl.pallas_call(
        _make_kernel(M, F, g),
        out_shape=jax.ShapeDtypeStruct((rows, g * F), jnp.float32),
        grid_spec=pltpu.PrefetchScalarGridSpec(
            num_scalar_prefetch=0,
            grid=grid,
            in_specs=[
                pl.BlockSpec((tr, g * M * F), lambda i: (i, 0)),     # streamed x tile
                pl.BlockSpec((1, F), lambda i: (0, 0)),              # resident weights
                pl.BlockSpec(memory_space=pltpu.MemorySpace.SMEM),   # scalar bias
            ],
            out_specs=pl.BlockSpec((tr, g * F), lambda i: (i, 0)),
        ),
        compiler_params=pltpu.CompilerParams(
            dimension_semantics=("parallel",),
            vmem_limit_bytes=48 * 1024 * 1024,
        ),
        cost_estimate=cost,
    )(x_fold, w, b)

    return out.reshape(n_pad, F)[:N]


if __name__ == "__main__":
    # Small shapes: N nodes, M metapaths, F features.
    N, M, F = 16, 4, 32

    key = jax.random.PRNGKey(0)
    kx, kw, kb = jax.random.split(key, 3)

    x = jax.random.normal(kx, (N, M, F), dtype=jnp.float32)

    # nn.Linear(F, 1) default init: U(-1/sqrt(F), 1/sqrt(F)), deterministic here.
    bound = 1.0 / (F ** 0.5)
    w = jax.random.uniform(kw, (1, F), dtype=jnp.float32, minval=-bound, maxval=bound)
    b = jax.random.uniform(kb, (1,), dtype=jnp.float32, minval=-bound, maxval=bound)

    out = attention_layer(x, w, b)
    out = jax.block_until_ready(out)

    # Pure-JAX reference (same math as the PyTorch module).
    att_ref = jnp.einsum("nmf,f->nm", x, w[0]) + b[0]        # (N, M)
    ref = jnp.einsum("nm,nmf->nf", att_ref, x)               # (N, F)
    assert out.shape == (N, F)
    assert jnp.allclose(out, ref, atol=1e-4, rtol=1e-4)

    # Second check: N not divisible by the tile and M*F not a multiple of 128,
    # exercising the wrapper padding + node-group folding path (grid of 2 steps).
    N2, M2, F2 = 50, 3, 32
    x2 = jax.random.normal(jax.random.PRNGKey(1), (N2, M2, F2), dtype=jnp.float32)
    out2 = jax.block_until_ready(attention_layer(x2, w, b))
    att2 = jnp.einsum("nmf,f->nm", x2, w[0]) + b[0]
    ref2 = jnp.einsum("nm,nmf->nf", att2, x2)
    assert out2.shape == (N2, F2)
    assert jnp.allclose(out2, ref2, atol=1e-4, rtol=1e-4)

    print("KERNEL_OK")
</pallas_src>

<mosaic_0001>
module attributes {stable_mosaic.version = 11 : i64} {
  func.func @kernel(%arg0: i32, %arg1: memref<8x512xf32, #tpu.memory_space<vmem>>, %arg2: memref<1x32xf32, #tpu.memory_space<vmem>>, %arg3: memref<1xf32, #tpu.memory_space<smem>>, %arg4: memref<8x128xf32, #tpu.memory_space<vmem>>) attributes {dimension_semantics = [#tpu.dimension_semantics<parallel>], iteration_bounds = array<i64: 1>, scalar_prefetch = 0 : i64, scratch_operands = 0 : i64, tpu.core_type = #tpu.core_type<tc>, window_params = [{transform_indices = @transform_0, window_bounds = array<i64: 8, 512>}, {pipeline_mode = #tpu.pipeline_mode<synchronous>, transform_indices = @transform_1, window_bounds = array<i64: 1, 32>}, {transform_indices = @transform_2, window_bounds = array<i64: 1>}, {transform_indices = @transform_3, window_bounds = array<i64: 8, 128>}]} {
    %c0 = arith.constant 0 : index
    %c0_0 = arith.constant 0 : index
    %0 = vector.load %arg1[%c0, %c0_0] : memref<8x512xf32, #tpu.memory_space<vmem>>, vector<8x512xf32>
    %c0_1 = arith.constant 0 : index
    %c0_2 = arith.constant 0 : index
    %1 = vector.load %arg2[%c0_1, %c0_2] : memref<1x32xf32, #tpu.memory_space<vmem>>, vector<1x32xf32>
    %c0_3 = arith.constant 0 : index
    %2 = memref.load %arg3[%c0_3] : memref<1xf32, #tpu.memory_space<smem>>
    %3 = vector.extract_strided_slice %0 {offsets = [0, 0], sizes = [8, 32], strides = [1, 1]} : vector<8x512xf32> to vector<8x32xf32>
    %4 = vector.broadcast %1 : vector<1x32xf32> to vector<8x32xf32>
    %5 = arith.mulf %3, %4 : vector<8x32xf32>
    %cst = arith.constant dense<0.000000e+00> : vector<8xf32>
    %6 = vector.multi_reduction <add>, %5, %cst [1] : vector<8x32xf32> to vector<8xf32>
    %7 = vector.shape_cast %6 : vector<8xf32> to vector<8x1xf32>
    %8 = vector.broadcast %2 : f32 to vector<8x1xf32>
    %9 = arith.addf %7, %8 : vector<8x1xf32>
    %10 = vector.broadcast %9 : vector<8x1xf32> to vector<8x32xf32>
    %11 = arith.mulf %10, %3 : vector<8x32xf32>
    %12 = vector.extract_strided_slice %0 {offsets = [0, 32], sizes = [8, 32], strides = [1, 1]} : vector<8x512xf32> to vector<8x32xf32>
    %13 = vector.broadcast %1 : vector<1x32xf32> to vector<8x32xf32>
    %14 = arith.mulf %12, %13 : vector<8x32xf32>
    %cst_4 = arith.constant dense<0.000000e+00> : vector<8xf32>
    %15 = vector.multi_reduction <add>, %14, %cst_4 [1] : vector<8x32xf32> to vector<8xf32>
    %16 = vector.shape_cast %15 : vector<8xf32> to vector<8x1xf32>
    %17 = vector.broadcast %2 : f32 to vector<8x1xf32>
    %18 = arith.addf %16, %17 : vector<8x1xf32>
    %19 = vector.broadcast %18 : vector<8x1xf32> to vector<8x32xf32>
    %20 = arith.mulf %19, %12 : vector<8x32xf32>
    %21 = arith.addf %11, %20 : vector<8x32xf32>
    %22 = vector.extract_strided_slice %0 {offsets = [0, 64], sizes = [8, 32], strides = [1, 1]} : vector<8x512xf32> to vector<8x32xf32>
    %23 = vector.broadcast %1 : vector<1x32xf32> to vector<8x32xf32>
    %24 = arith.mulf %22, %23 : vector<8x32xf32>
    %cst_5 = arith.constant dense<0.000000e+00> : vector<8xf32>
    %25 = vector.multi_reduction <add>, %24, %cst_5 [1] : vector<8x32xf32> to vector<8xf32>
    %26 = vector.shape_cast %25 : vector<8xf32> to vector<8x1xf32>
    %27 = vector.broadcast %2 : f32 to vector<8x1xf32>
    %28 = arith.addf %26, %27 : vector<8x1xf32>
    %29 = vector.broadcast %28 : vector<8x1xf32> to vector<8x32xf32>
    %30 = arith.mulf %29, %22 : vector<8x32xf32>
    %31 = arith.addf %21, %30 : vector<8x32xf32>
    %32 = vector.extract_strided_slice %0 {offsets = [0, 96], sizes = [8, 32], strides = [1, 1]} : vector<8x512xf32> to vector<8x32xf32>
    %33 = vector.broadcast %1 : vector<1x32xf32> to vector<8x32xf32>
    %34 = arith.mulf %32, %33 : vector<8x32xf32>
    %cst_6 = arith.constant dense<0.000000e+00> : vector<8xf32>
    %35 = vector.multi_reduction <add>, %34, %cst_6 [1] : vector<8x32xf32> to vector<8xf32>
    %36 = vector.shape_cast %35 : vector<8xf32> to vector<8x1xf32>
    %37 = vector.broadcast %2 : f32 to vector<8x1xf32>
    %38 = arith.addf %36, %37 : vector<8x1xf32>
    %39 = vector.broadcast %38 : vector<8x1xf32> to vector<8x32xf32>
    %40 = arith.mulf %39, %32 : vector<8x32xf32>
    %41 = arith.addf %31, %40 : vector<8x32xf32>
    %c0_7 = arith.constant 0 : index
    %c0_8 = arith.constant 0 : index
    %42 = vector.load %arg4[%c0_7, %c0_8] : memref<8x128xf32, #tpu.memory_space<vmem>>, vector<8x32xf32>
    tpu.vector_store %arg4[%c0_7, %c0_8], %41 {strides = array<i32>} : memref<8x128xf32, #tpu.memory_space<vmem>>, vector<8x32xf32>,
    %43 = vector.extract_strided_slice %0 {offsets = [0, 128], sizes = [8, 32], strides = [1, 1]} : vector<8x512xf32> to vector<8x32xf32>
    %44 = vector.broadcast %1 : vector<1x32xf32> to vector<8x32xf32>
    %45 = arith.mulf %43, %44 : vector<8x32xf32>
    %cst_9 = arith.constant dense<0.000000e+00> : vector<8xf32>
    %46 = vector.multi_reduction <add>, %45, %cst_9 [1] : vector<8x32xf32> to vector<8xf32>
    %47 = vector.shape_cast %46 : vector<8xf32> to vector<8x1xf32>
    %48 = vector.broadcast %2 : f32 to vector<8x1xf32>
    %49 = arith.addf %47, %48 : vector<8x1xf32>
    %50 = vector.broadcast %49 : vector<8x1xf32> to vector<8x32xf32>
    %51 = arith.mulf %50, %43 : vector<8x32xf32>
    %52 = vector.extract_strided_slice %0 {offsets = [0, 160], sizes = [8, 32], strides = [1, 1]} : vector<8x512xf32> to vector<8x32xf32>
    %53 = vector.broadcast %1 : vector<1x32xf32> to vector<8x32xf32>
    %54 = arith.mulf %52, %53 : vector<8x32xf32>
    %cst_10 = arith.constant dense<0.000000e+00> : vector<8xf32>
    %55 = vector.multi_reduction <add>, %54, %cst_10 [1] : vector<8x32xf32> to vector<8xf32>
    %56 = vector.shape_cast %55 : vector<8xf32> to vector<8x1xf32>
    %57 = vector.broadcast %2 : f32 to vector<8x1xf32>
    %58 = arith.addf %56, %57 : vector<8x1xf32>
    %59 = vector.broadcast %58 : vector<8x1xf32> to vector<8x32xf32>
    %60 = arith.mulf %59, %52 : vector<8x32xf32>
    %61 = arith.addf %51, %60 : vector<8x32xf32>
    %62 = vector.extract_strided_slice %0 {offsets = [0, 192], sizes = [8, 32], strides = [1, 1]} : vector<8x512xf32> to vector<8x32xf32>
    %63 = vector.broadcast %1 : vector<1x32xf32> to vector<8x32xf32>
    %64 = arith.mulf %62, %63 : vector<8x32xf32>
    %cst_11 = arith.constant dense<0.000000e+00> : vector<8xf32>
    %65 = vector.multi_reduction <add>, %64, %cst_11 [1] : vector<8x32xf32> to vector<8xf32>
    %66 = vector.shape_cast %65 : vector<8xf32> to vector<8x1xf32>
    %67 = vector.broadcast %2 : f32 to vector<8x1xf32>
    %68 = arith.addf %66, %67 : vector<8x1xf32>
    %69 = vector.broadcast %68 : vector<8x1xf32> to vector<8x32xf32>
    %70 = arith.mulf %69, %62 : vector<8x32xf32>
    %71 = arith.addf %61, %70 : vector<8x32xf32>
    %72 = vector.extract_strided_slice %0 {offsets = [0, 224], sizes = [8, 32], strides = [1, 1]} : vector<8x512xf32> to vector<8x32xf32>
    %73 = vector.broadcast %1 : vector<1x32xf32> to vector<8x32xf32>
    %74 = arith.mulf %72, %73 : vector<8x32xf32>
    %cst_12 = arith.constant dense<0.000000e+00> : vector<8xf32>
    %75 = vector.multi_reduction <add>, %74, %cst_12 [1] : vector<8x32xf32> to vector<8xf32>
    %76 = vector.shape_cast %75 : vector<8xf32> to vector<8x1xf32>
    %77 = vector.broadcast %2 : f32 to vector<8x1xf32>
    %78 = arith.addf %76, %77 : vector<8x1xf32>
    %79 = vector.broadcast %78 : vector<8x1xf32> to vector<8x32xf32>
    %80 = arith.mulf %79, %72 : vector<8x32xf32>
    %81 = arith.addf %71, %80 : vector<8x32xf32>
    %c0_13 = arith.constant 0 : index
    %c32 = arith.constant 32 : index
    %82 = vector.load %arg4[%c0_13, %c32] : memref<8x128xf32, #tpu.memory_space<vmem>>, vector<8x32xf32>
    tpu.vector_store %arg4[%c0_13, %c32], %81 {strides = array<i32>} : memref<8x128xf32, #tpu.memory_space<vmem>>, vector<8x32xf32>,
    %83 = vector.extract_strided_slice %0 {offsets = [0, 256], sizes = [8, 32], strides = [1, 1]} : vector<8x512xf32> to vector<8x32xf32>
    %84 = vector.broadcast %1 : vector<1x32xf32> to vector<8x32xf32>
    %85 = arith.mulf %83, %84 : vector<8x32xf32>
    %cst_14 = arith.constant dense<0.000000e+00> : vector<8xf32>
    %86 = vector.multi_reduction <add>, %85, %cst_14 [1] : vector<8x32xf32> to vector<8xf32>
    %87 = vector.shape_cast %86 : vector<8xf32> to vector<8x1xf32>
    %88 = vector.broadcast %2 : f32 to vector<8x1xf32>
    %89 = arith.addf %87, %88 : vector<8x1xf32>
    %90 = vector.broadcast %89 : vector<8x1xf32> to vector<8x32xf32>
    %91 = arith.mulf %90, %83 : vector<8x32xf32>
    %92 = vector.extract_strided_slice %0 {offsets = [0, 288], sizes = [8, 32], strides = [1, 1]} : vector<8x512xf32> to vector<8x32xf32>
    %93 = vector.broadcast %1 : vector<1x32xf32> to vector<8x32xf32>
    %94 = arith.mulf %92, %93 : vector<8x32xf32>
    %cst_15 = arith.constant dense<0.000000e+00> : vector<8xf32>
    %95 = vector.multi_reduction <add>, %94, %cst_15 [1] : vector<8x32xf32> to vector<8xf32>
    %96 = vector.shape_cast %95 : vector<8xf32> to vector<8x1xf32>
    %97 = vector.broadcast %2 : f32 to vector<8x1xf32>
    %98 = arith.addf %96, %97 : vector<8x1xf32>
    %99 = vector.broadcast %98 : vector<8x1xf32> to vector<8x32xf32>
    %100 = arith.mulf %99, %92 : vector<8x32xf32>
    %101 = arith.addf %91, %100 : vector<8x32xf32>
    %102 = vector.extract_strided_slice %0 {offsets = [0, 320], sizes = [8, 32], strides = [1, 1]} : vector<8x512xf32> to vector<8x32xf32>
    %103 = vector.broadcast %1 : vector<1x32xf32> to vector<8x32xf32>
    %104 = arith.mulf %102, %103 : vector<8x32xf32>
    %cst_16 = arith.constant dense<0.000000e+00> : vector<8xf32>
    %105 = vector.multi_reduction <add>, %104, %cst_16 [1] : vector<8x32xf32> to vector<8xf32>
    %106 = vector.shape_cast %105 : vector<8xf32> to vector<8x1xf32>
    %107 = vector.broadcast %2 : f32 to vector<8x1xf32>
    %108 = arith.addf %106, %107 : vector<8x1xf32>
    %109 = vector.broadcast %108 : vector<8x1xf32> to vector<8x32xf32>
    %110 = arith.mulf %109, %102 : vector<8x32xf32>
    %111 = arith.addf %101, %110 : vector<8x32xf32>
    %112 = vector.extract_strided_slice %0 {offsets = [0, 352], sizes = [8, 32], strides = [1, 1]} : vector<8x512xf32> to vector<8x32xf32>
    %113 = vector.broadcast %1 : vector<1x32xf32> to vector<8x32xf32>
    %114 = arith.mulf %112, %113 : vector<8x32xf32>
    %cst_17 = arith.constant dense<0.000000e+00> : vector<8xf32>
    %115 = vector.multi_reduction <add>, %114, %cst_17 [1] : vector<8x32xf32> to vector<8xf32>
    %116 = vector.shape_cast %115 : vector<8xf32> to vector<8x1xf32>
    %117 = vector.broadcast %2 : f32 to vector<8x1xf32>
    %118 = arith.addf %116, %117 : vector<8x1xf32>
    %119 = vector.broadcast %118 : vector<8x1xf32> to vector<8x32xf32>
    %120 = arith.mulf %119, %112 : vector<8x32xf32>
    %121 = arith.addf %111, %120 : vector<8x32xf32>
    %c0_18 = arith.constant 0 : index
    %c64 = arith.constant 64 : index
    %122 = vector.load %arg4[%c0_18, %c64] : memref<8x128xf32, #tpu.memory_space<vmem>>, vector<8x32xf32>
    tpu.vector_store %arg4[%c0_18, %c64], %121 {strides = array<i32>} : memref<8x128xf32, #tpu.memory_space<vmem>>, vector<8x32xf32>,
    %123 = vector.extract_strided_slice %0 {offsets = [0, 384], sizes = [8, 32], strides = [1, 1]} : vector<8x512xf32> to vector<8x32xf32>
    %124 = vector.broadcast %1 : vector<1x32xf32> to vector<8x32xf32>
    %125 = arith.mulf %123, %124 : vector<8x32xf32>
    %cst_19 = arith.constant dense<0.000000e+00> : vector<8xf32>
    %126 = vector.multi_reduction <add>, %125, %cst_19 [1] : vector<8x32xf32> to vector<8xf32>
    %127 = vector.shape_cast %126 : vector<8xf32> to vector<8x1xf32>
    %128 = vector.broadcast %2 : f32 to vector<8x1xf32>
    %129 = arith.addf %127, %128 : vector<8x1xf32>
    %130 = vector.broadcast %129 : vector<8x1xf32> to vector<8x32xf32>
    %131 = arith.mulf %130, %123 : vector<8x32xf32>
    %132 = vector.extract_strided_slice %0 {offsets = [0, 416], sizes = [8, 32], strides = [1, 1]} : vector<8x512xf32> to vector<8x32xf32>
    %133 = vector.broadcast %1 : vector<1x32xf32> to vector<8x32xf32>
    %134 = arith.mulf %132, %133 : vector<8x32xf32>
    %cst_20 = arith.constant dense<0.000000e+00> : vector<8xf32>
    %135 = vector.multi_reduction <add>, %134, %cst_20 [1] : vector<8x32xf32> to vector<8xf32>
    %136 = vector.shape_cast %135 : vector<8xf32> to vector<8x1xf32>
    %137 = vector.broadcast %2 : f32 to vector<8x1xf32>
    %138 = arith.addf %136, %137 : vector<8x1xf32>
    %139 = vector.broadcast %138 : vector<8x1xf32> to vector<8x32xf32>
    %140 = arith.mulf %139, %132 : vector<8x32xf32>
    %141 = arith.addf %131, %140 : vector<8x32xf32>
    %142 = vector.extract_strided_slice %0 {offsets = [0, 448], sizes = [8, 32], strides = [1, 1]} : vector<8x512xf32> to vector<8x32xf32>
    %143 = vector.broadcast %1 : vector<1x32xf32> to vector<8x32xf32>
    %144 = arith.mulf %142, %143 : vector<8x32xf32>
    %cst_21 = arith.constant dense<0.000000e+00> : vector<8xf32>
    %145 = vector.multi_reduction <add>, %144, %cst_21 [1] : vector<8x32xf32> to vector<8xf32>
    %146 = vector.shape_cast %145 : vector<8xf32> to vector<8x1xf32>
    %147 = vector.broadcast %2 : f32 to vector<8x1xf32>
    %148 = arith.addf %146, %147 : vector<8x1xf32>
    %149 = vector.broadcast %148 : vector<8x1xf32> to vector<8x32xf32>
    %150 = arith.mulf %149, %142 : vector<8x32xf32>
    %151 = arith.addf %141, %150 : vector<8x32xf32>
    %152 = vector.extract_strided_slice %0 {offsets = [0, 480], sizes = [8, 32], strides = [1, 1]} : vector<8x512xf32> to vector<8x32xf32>
    %153 = vector.broadcast %1 : vector<1x32xf32> to vector<8x32xf32>
    %154 = arith.mulf %152, %153 : vector<8x32xf32>
    %cst_22 = arith.constant dense<0.000000e+00> : vector<8xf32>
    %155 = vector.multi_reduction <add>, %154, %cst_22 [1] : vector<8x32xf32> to vector<8xf32>
    %156 = vector.shape_cast %155 : vector<8xf32> to vector<8x1xf32>
    %157 = vector.broadcast %2 : f32 to vector<8x1xf32>
    %158 = arith.addf %156, %157 : vector<8x1xf32>
    %159 = vector.broadcast %158 : vector<8x1xf32> to vector<8x32xf32>
    %160 = arith.mulf %159, %152 : vector<8x32xf32>
    %161 = arith.addf %151, %160 : vector<8x32xf32>
    %c0_23 = arith.constant 0 : index
    %c96 = arith.constant 96 : index
    %162 = vector.load %arg4[%c0_23, %c96] : memref<8x128xf32, #tpu.memory_space<vmem>>, vector<8x32xf32>
    tpu.vector_store %arg4[%c0_23, %c96], %161 {strides = array<i32>} : memref<8x128xf32, #tpu.memory_space<vmem>>, vector<8x32xf32>,
    return
  }
  func.func @transform_0(%arg0: i32) -> (i32, i32) {
    %c0_i32 = arith.constant 0 : i32
    %c0_i32_0 = arith.constant 0 : i32
    return %arg0, %c0_i32 : i32, i32
  }
  func.func @transform_1(%arg0: i32) -> (i32, i32) {
    %c0_i32 = arith.constant 0 : i32
    %c0_i32_0 = arith.constant 0 : i32
    %c0_i32_1 = arith.constant 0 : i32
    return %c0_i32, %c0_i32_0 : i32, i32
  }
  func.func @transform_2(%arg0: i32) -> i32 {
    %c0_i32 = arith.constant 0 : i32
    %c0_i32_0 = arith.constant 0 : i32
    return %c0_i32 : i32
  }
  func.func @transform_3(%arg0: i32) -> (i32, i32) {
    %c0_i32 = arith.constant 0 : i32
    %c0_i32_0 = arith.constant 0 : i32
    return %arg0, %c0_i32 : i32, i32
  }
}

</mosaic_0001>

<bundles_post_ra>
// kernel: tpu_custom_call.1
= control target key start
LH: loop header
LB: loop body
LE: loop exit
PB: predicated region body
PF: predicated region fallthrough
CT: control target
= control target key end

     0   :  { %9 = vsyncpa [#allocation4], 0  ;;  %s521_s0 = inlined_call_operand.hbm [shape: f32[8,512], index: 0, kind: input, shape index: {}]   ;;  %s522_s1 = inlined_call_operand.vmem [shape: f32[1,32], index: 1, kind: input, shape index: {}]   ;;  %s523_s2 = inlined_call_operand.<no memory space> [shape: f32[1], index: 2, kind: input, shape index: {}]   ;;  %s524_s3 = inlined_call_operand.hbm [shape: f32[8,128], index: 3, kind: output, shape index: {}]  }
   0x1   :  { %10 = vsyncpa [#allocation5], 0  ;;  %s343_s12 = smov [#allocation3]   ;;  %s295_s16 = scalar_lea.hbm %s521_s0, 512 }
   0x2   :  { %s17_s13 = sshll.u32 %s343_s12, 4  ;;  %p296_p0 = scmp.ne.s32.totalorder %s521_s0, %s295_s16  ;;  %s18_s13 = int_to_ptr.vmem [resolvable:$true] %s17_s13 }
   0x3   :  { %p299_p1 = scmp.lt.u32.totalorder %s295_s16, %s521_s0 }
   0x5   :  { %p301_p2 = pnand %p299_p1, %p296_p0 }
   0x7   :  { %304 = shalt.err (!%p301_p2)
}
   0x8   :  { %s305_s21 = scalar_lea.vmem %s18_s13, 512  ;;  %p310_p4 = scmp.lt.s32.totalorder %s18_s13, %s18_s13 }
   0x9   :  { %p306_p3 = scmp.ne.s32.totalorder %s18_s13, %s305_s21  ;;  %p311_p5 = scmp.lt.s32.totalorder %s305_s21, %s305_s21 }
   0xb   :  { %p312_p6 = por %p311_p5, %p310_p4 }
   0xd   :  { %p313_p7 = pnand %p312_p6, %p306_p3 }
   0xf   :  { %316 = shalt.err (!%p313_p7)
}
  0x10   :  { %20 = dma.hbm_to_vmem [thread:$0]  %s521_s0, 512, %s18_s13, [#allocation4]  }
  0x11   :  { %339 = dma.done.wait [#allocation4], 512  }
  0x12   :  { %340 = vsyncadd [#allocation4], 4294966784  ;;  %v380_v0 = vld [vmem:[#allocation3] sm:$0xff]  ;;  %vm41_vm0 = vcmask 261120   ;;  %s344_s26 = smov 96   ;;  %s345_s0 = smov 32   ;;  %v453_v53 = vstv %s523_s2 }
  0x13   :  { %v385_v1 = vld [vmem:[%s522_s1] ss:$0 sm:$0xff]  ;;  %s346_s27 = smov 64   ;;  %v396_v4 = vld [vmem:[#allocation3 + $0x8] sm:$0xff]  ;;  %v411_v16 = vld [vmem:[#allocation3 + $0x10] sm:$0xff]  ;;  %vm158_vm1 = vcmask 523520  }
  0x14   :  { %v40_v2 = vmul.f32 %v385_v1, %v380_v0  ;;  %84 = vrot.lane.b32.xlu1 %v385_v1, %s344_s26  ;;  %v103_v5 = vmul.f32 %v385_v1, %v396_v4  ;;  %v417_v19 = vld [vmem:[#allocation3 + $0x18] sm:$0xff]  ;;  %v160_v25 = vmul.f32 %v385_v1, %v411_v16  ;;  %vm215_vm2 = vcmask 785920   ;;  %s347_s2 = smov [#allocation6]  }
  0x15   :  { %s280_s29 = sshll.u32 %s347_s2, 4  ;;  %vm272_vm3 = vcmask 1048320   ;;  %s281_s29 = int_to_ptr.vmem [resolvable:$true] %s280_s29 }
  0x16   :  { %v42_v3 = vsel %vm41_vm0, %v40_v2, 0.0  ;;  %v104_v6 = vsel %vm41_vm0, %v103_v5, 0.0  ;;  %v161_v26 = vsel %vm41_vm0, %v160_v25, 0.0  ;;  %s317_s30 = scalar_lea.vmem %s281_s29, 128  ;;  %p322_p9 = scmp.lt.s32.totalorder %s281_s29, %s281_s29 }
  0x17   :  { %43 = vadd.xlane.f32.xlu0 %v42_v3  ;;  %p318_p8 = scmp.ne.s32.totalorder %s281_s29, %s317_s30  ;;  %p323_p10 = scmp.lt.s32.totalorder %s317_s30, %s317_s30 }
  0x19   :  { %p324_p11 = por %p323_p10, %p322_p9 }
  0x1b   :  { %p325_p12 = pnand %p324_p11, %p318_p8 }
  0x2d   :  { %48 = vrot.lane.b32.xlu0 %v385_v1, %s345_s0 }
  0x31   :  { %66 = vrot.lane.b32.xlu0 %v385_v1, %s346_s27 }
  0x50   :  { %105 = vadd.xlane.f32.xlu0 %v104_v6 }
  0x86   :  { %v85_v9 = vpop.permute.xlu1 %84 }
  0x87   :  { %v87_v11 = vmul.f32 %v85_v9, %v380_v0  ;;  %v139_v21 = vmul.f32 %v85_v9, %v396_v4  ;;  %v196_v23 = vmul.f32 %v85_v9, %v411_v16  ;;  %v253_v24 = vmul.f32 %v85_v9, %v417_v19 }
  0xa4   :  { %v401_v7 = vpop.xlane.xlu0 %43 }
  0xa8   :  { %v49_v8 = vpop.permute.xlu0 %48 }
  0xa9   :  { %v51_v10 = vmul.f32 %v49_v8, %v380_v0  ;;  %v109_v15 = vmul.f32 %v49_v8, %v396_v4  ;;  %v166_v18 = vmul.f32 %v49_v8, %v411_v16  ;;  %v223_v20 = vmul.f32 %v49_v8, %v417_v19 }
  0xab   :  { %53 = vrot.lane.b32.xlu1 %v51_v10, %s344_s26 }
  0xac   :  { %v67_v12 = vpop.permute.xlu0 %66 }
  0xad   :  { %v69_v13 = vmul.f32 %v67_v12, %v380_v0  ;;  %v124_v14 = vmul.f32 %v67_v12, %v396_v4  ;;  %v181_v17 = vmul.f32 %v67_v12, %v411_v16  ;;  %v238_v22 = vmul.f32 %v67_v12, %v417_v19 }
  0xaf   :  { %89 = vrot.lane.b32.xlu1 %v87_v11, %s345_s0  ;;  %71 = vrot.lane.b32.xlu0 %v69_v13, %s346_s27 }
  0xb3   :  { %111 = vrot.lane.b32.xlu1 %v109_v15, %s344_s26  ;;  %126 = vrot.lane.b32.xlu0 %v124_v14, %s346_s27 }
  0xb7   :  { %168 = vrot.lane.b32.xlu1 %v166_v18, %s344_s26  ;;  %183 = vrot.lane.b32.xlu0 %v181_v17, %s346_s27 }
  0xbb   :  { %225 = vrot.lane.b32.xlu1 %v223_v20, %s344_s26 }
  0xbf   :  { %141 = vrot.lane.b32.xlu1 %v139_v21, %s345_s0 }
  0xc3   :  { %240 = vrot.lane.b32.xlu1 %v238_v22, %s346_s27 }
  0xc7   :  { %198 = vrot.lane.b32.xlu1 %v196_v23, %s345_s0 }
  0xcb   :  { %255 = vrot.lane.b32.xlu1 %v253_v24, %s345_s0 }
  0xd6   :  { %162 = vadd.xlane.f32.xlu0 %v161_v26 }
  0xdd   :  { %v434_v27 = vpop.xlane.xlu0 %105 }
 0x11d   :  { %v54_v28 = vpop.permute.xlu1 %53 }
 0x11e   :  { %v56_v29 = vsel %vm41_vm0, %v54_v28, 0.0 }
 0x11f   :  { %57 = vadd.xlane.f32.xlu1 %v56_v29 }
 0x121   :  { %v90_v30 = vpop.permute.xlu1 %89  ;;  %v72_v31 = vpop.permute.xlu0 %71 }
 0x122   :  { %v92_v32 = vsel %vm41_vm0, %v90_v30, 0.0  ;;  %v74_v33 = vsel %vm41_vm0, %v72_v31, 0.0 }
 0x123   :  { %93 = vadd.xlane.f32.xlu1 %v92_v32  ;;  %75 = vadd.xlane.f32.xlu0 %v74_v33  ;;  %v46_v33 = vadd.f32 %v453_v53, %v401_v7 }
 0x125   :  { %v112_v34 = vpop.permute.xlu1 %111  ;;  %v127_v35 = vpop.permute.xlu0 %126 }
 0x126   :  { %v114_v36 = vsel %vm41_vm0, %v112_v34, 0.0  ;;  %v129_v37 = vsel %vm41_vm0, %v127_v35, 0.0  ;;  %v47_v35 = vmul.f32 %v46_v33, %v380_v0 }
 0x127   :  { %115 = vadd.xlane.f32.xlu1 %v114_v36  ;;  %130 = vadd.xlane.f32.xlu0 %v129_v37 }
 0x129   :  { %v169_v38 = vpop.permute.xlu1 %168  ;;  %v184_v47 = vpop.permute.xlu0 %183 }
 0x12a   :  { %v171_v43 = vsel %vm41_vm0, %v169_v38, 0.0  ;;  %v186_v50 = vsel %vm41_vm0, %v184_v47, 0.0 }
 0x12d   :  { %v226_v39 = vpop.permute.xlu1 %225 }
 0x12e   :  { %v228_v46 = vsel %vm41_vm0, %v226_v39, 0.0 }
 0x131   :  { %v142_v40 = vpop.permute.xlu1 %141 }
 0x132   :  { %v144_v41 = vsel %vm41_vm0, %v142_v40, 0.0 }
 0x133   :  { %145 = vadd.xlane.f32.xlu1 %v144_v41  ;;  %v107_v41 = vadd.f32 %v434_v27, %v453_v53 }
 0x135   :  { %v241_v42 = vpop.permute.xlu1 %240 }
 0x136   :  { %v243_v44 = vsel %vm41_vm0, %v241_v42, 0.0 }
 0x137   :  { %172 = vadd.xlane.f32.xlu1 %v171_v43  ;;  %244 = vadd.xlane.f32.xlu0 %v243_v44  ;;  %v108_v43 = vmul.f32 %v107_v41, %v396_v4 }
 0x139   :  { %v199_v45 = vpop.permute.xlu1 %198 }
 0x13a   :  { %v201_v51 = vsel %vm41_vm0, %v199_v45, 0.0 }
 0x13b   :  { %229 = vadd.xlane.f32.xlu1 %v228_v46 }
 0x13d   :  { %v256_v48 = vpop.permute.xlu1 %255 }
 0x13e   :  { %v258_v49 = vsel %vm41_vm0, %v256_v48, 0.0 }
 0x13f   :  { %259 = vadd.xlane.f32.xlu0 %v258_v49  ;;  %187 = vadd.xlane.f32.xlu1 %v186_v50 }
 0x143   :  { %202 = vadd.xlane.f32.xlu1 %v201_v51 }
 0x163   :  { %v448_v52 = vpop.xlane.xlu0 %162 }
 0x1ac   :  { %v58_v54 = vpop.xlane.xlu1 %57 }
 0x1ad   :  { %v59_v55 = vadd.f32 %v58_v54, %v453_v53 }
 0x1af   :  { %v60_v56 = vmul.f32 %v59_v55, %v380_v0 }
 0x1b0   :  { %v94_v57 = vpop.xlane.xlu1 %93  ;;  %v76_v58 = vpop.xlane.xlu0 %75 }
 0x1b1   :  { %v95_v59 = vadd.f32 %v94_v57, %v453_v53  ;;  %v77_v60 = vadd.f32 %v76_v58, %v453_v53  ;;  %62 = vrot.lane.b32.xlu0 %v60_v56, %s344_s26 }
 0x1b3   :  { %v96_v61 = vmul.f32 %v95_v59, %v380_v0  ;;  %v78_v62 = vmul.f32 %v77_v60, %v380_v0  ;;  %v164_v0 = vadd.f32 %v448_v52, %v453_v53 }
 0x1b4   :  { %v116_v63 = vpop.xlane.xlu1 %115  ;;  %v131_v2 = vpop.xlane.xlu0 %130 }
 0x1b5   :  { %v117_v3 = vadd.f32 %v116_v63, %v453_v53  ;;  %98 = vrot.lane.b32.xlu0 %v96_v61, %s345_s0  ;;  %80 = vrot.lane.b32.xlu1 %v78_v62, %s346_s27  ;;  %v132_v5 = vadd.f32 %v131_v2, %v453_v53  ;;  %v165_v49 = vmul.f32 %v164_v0, %v411_v16 }
 0x1b7   :  { %v118_v6 = vmul.f32 %v117_v3, %v396_v4  ;;  %v133_v8 = vmul.f32 %v132_v5, %v396_v4 }
 0x1b9   :  { %120 = vrot.lane.b32.xlu0 %v118_v6, %s344_s26  ;;  %135 = vrot.lane.b32.xlu1 %v133_v8, %s346_s27 }
 0x1c0   :  { %v146_v9 = vpop.xlane.xlu1 %145 }
 0x1c1   :  { %v147_v10 = vadd.f32 %v146_v9, %v453_v53 }
 0x1c3   :  { %v148_v11 = vmul.f32 %v147_v10, %v396_v4  ;;  %v217_v4 = vmul.f32 %v385_v1, %v417_v19 }
 0x1c4   :  { %v173_v12 = vpop.xlane.xlu1 %172  ;;  %v245_v25 = vpop.xlane.xlu0 %244 }
 0x1c5   :  { %v174_v13 = vadd.f32 %v173_v12, %v453_v53  ;;  %150 = vrot.lane.b32.xlu0 %v148_v11, %s345_s0  ;;  %v246_v26 = vadd.f32 %v245_v25, %v453_v53  ;;  %v218_v56 = vsel %vm41_vm0, %v217_v4, 0.0 }
 0x1c7   :  { %v175_v14 = vmul.f32 %v174_v13, %v411_v16  ;;  %v247_v30 = vmul.f32 %v246_v26, %v417_v19 }
 0x1c8   :  { %v230_v15 = vpop.xlane.xlu1 %229 }
 0x1c9   :  { %177 = vrot.lane.b32.xlu1 %v175_v14, %s344_s26  ;;  %v231_v23 = vadd.f32 %v230_v15, %v453_v53 }
 0x1cb   :  { %v232_v28 = vmul.f32 %v231_v23, %v417_v19 }
 0x1cc   :  { %v188_v17 = vpop.xlane.xlu1 %187  ;;  %v260_v29 = vpop.xlane.xlu0 %259 }
 0x1cd   :  { %v189_v18 = vadd.f32 %v188_v17, %v453_v53  ;;  %v261_v31 = vadd.f32 %v260_v29, %v453_v53 }
 0x1cf   :  { %v190_v20 = vmul.f32 %v189_v18, %v411_v16  ;;  %v262_v32 = vmul.f32 %v261_v31, %v417_v19 }
 0x1d0   :  { %v203_v21 = vpop.xlane.xlu1 %202 }
 0x1d1   :  { %v204_v22 = vadd.f32 %v203_v21, %v453_v53  ;;  %192 = vrot.lane.b32.xlu0 %v190_v20, %s346_s27 }
 0x1d3   :  { %v205_v24 = vmul.f32 %v204_v22, %v411_v16 }
 0x1d5   :  { %207 = vrot.lane.b32.xlu1 %v205_v24, %s345_s0 }
 0x1d9   :  { %234 = vrot.lane.b32.xlu1 %v232_v28, %s344_s26 }
 0x1dd   :  { %249 = vrot.lane.b32.xlu1 %v247_v30, %s346_s27 }
 0x1e1   :  { %264 = vrot.lane.b32.xlu1 %v262_v32, %s345_s0 }
 0x223   :  { %v63_v34 = vpop.permute.xlu0 %62 }
 0x224   :  { %v65_v36 = vadd.f32 %v63_v34, %v47_v35 }
 0x227   :  { %v81_v37 = vpop.permute.xlu1 %80  ;;  %v99_v39 = vpop.permute.xlu0 %98 }
 0x228   :  { %v83_v38 = vadd.f32 %v81_v37, %v65_v36 }
 0x22a   :  { %v101_v40 = vadd.f32 %v99_v39, %v83_v38 }
 0x22b   :  { %v121_v42 = vpop.permute.xlu0 %120  ;;  %v136_v45 = vpop.permute.xlu1 %135 }
 0x22c   :  { %102 = vst.msk [vmem:[#allocation6] sm:$0xff] %vm41_vm0, %v101_v40  ;;  %v123_v44 = vadd.f32 %v121_v42, %v108_v43 }
 0x22e   :  { %v138_v46 = vadd.f32 %v136_v45, %v123_v44 }
 0x237   :  { %v151_v7 = vpop.permute.xlu0 %150 }
 0x238   :  { %v153_v47 = vadd.f32 %v151_v7, %v138_v46 }
 0x23a   :  { %155 = vrot.lane.b32.xlu0 %v153_v47, %s345_s0 }
 0x23b   :  { %v178_v48 = vpop.permute.xlu1 %177 }
 0x23c   :  { %v180_v27 = vadd.f32 %v178_v48, %v165_v49 }
 0x243   :  { %v193_v50 = vpop.permute.xlu0 %192 }
 0x244   :  { %v195_v51 = vadd.f32 %v193_v50, %v180_v27 }
 0x247   :  { %v208_v54 = vpop.permute.xlu1 %207 }
 0x248   :  { %v210_v55 = vadd.f32 %v208_v54, %v195_v51 }
 0x24a   :  { %212 = vrot.lane.b32.xlu1 %v210_v55, %s346_s27 }
 0x24b   :  { %v235_v57 = vpop.permute.xlu1 %234 }
 0x24f   :  { %v250_v52 = vpop.permute.xlu1 %249 }
 0x253   :  { %v265_v59 = vpop.permute.xlu1 %264 }
 0x259   :  { %219 = vadd.xlane.f32.xlu0 %v218_v56 }
 0x2ac   :  { %v156_v58 = vpop.permute.xlu0 %155 }
 0x2ad   :  { %159 = vst.msk [vmem:[#allocation6] sm:$0xff] %vm158_vm1, %v156_v58 }
 0x2bc   :  { %v213_v16 = vpop.permute.xlu1 %212 }
 0x2bd   :  { %216 = vst.msk [vmem:[#allocation6] sm:$0xff] %vm215_vm2, %v213_v16 }
 0x2e6   :  { %v220_v60 = vpop.xlane.xlu0 %219 }
 0x2e7   :  { %v221_v61 = vadd.f32 %v220_v60, %v453_v53 }
 0x2e9   :  { %v222_v62 = vmul.f32 %v221_v61, %v417_v19 }
 0x2eb   :  { %v237_v63 = vadd.f32 %v235_v57, %v222_v62 }
 0x2ed   :  { %v252_v2 = vadd.f32 %v250_v52, %v237_v63 }
 0x2ef   :  { %v267_v1 = vadd.f32 %v265_v59, %v252_v2 }
 0x2f1   :  { %269 = vrot.lane.b32.xlu1 %v267_v1, %s344_s26 }
 0x363   :  { %v270_v3 = vpop.permute.xlu1 %269 }
 0x364   :  { %273 = vst.msk [vmem:[#allocation6] sm:$0xff] %vm272_vm3, %v270_v3 }
 0x365   :  { %328 = shalt.err (!%p325_p12)
}
 0x366   :  { %s329_s6 = scalar_lea.hbm %s524_s3, 128 }
 0x367   :  { %p330_p13 = scmp.ne.s32.totalorder %s524_s3, %s329_s6  ;;  %p333_p0 = scmp.lt.u32.totalorder %s329_s6, %s524_s3 }
 0x369   :  { %p335_p1 = pnand %p333_p0, %p330_p13 }
 0x36b   :  { %338 = shalt.err (!%p335_p1)
}
 0x36c   :  { %283 = dma.vmem_to_hbm [thread:$0]  %s281_s29, 128, %s524_s3, [#allocation5]  }
 0x36d   :  { %341 = dma.done.wait [#allocation5], 128  }
 0x36e   :  { %342 = vsyncadd [#allocation5], 4294967168 }
 0x36f   :  { %287 = vsyncpa [#allocation4], 1 }
 0x370   :  { %288 = vsyncpa [#allocation5], 1 }

</bundles_post_ra>
